<compile_context>
chip_gen: v6e
topology: v6e:2x2x1
jax: 0.10.0
libtpu: 0.0.40
codegen_flags: <defaults>
</compile_context>

<pallas_src>
import functools

import jax
import jax.numpy as jnp
from jax.experimental import pallas as pl
from jax.experimental.pallas import tpu as pltpu

NUM_CLASSES = 10     # args.num_classes
BETA = 0.5           # args.beta
EPS = 1e-5           # self.eps
NUM_CORES = 2        # split the reduction across v7x's two TCs
TM_MAX = 16384       # per-step tile width (lanes = batch samples)


def _round_up(x, m):
    return (x + m - 1) // m * m


def _daloss_kernel(xid_ref, tid_ref, xood_ref, tl_ref, out_ref,
                   lse_acc, xt_acc, rm_acc, mk_acc, *, eps):
    i = pl.program_id(1)

    @pl.when(i == 0)
    def _():
        lse_acc[...] = jnp.zeros_like(lse_acc)
        xt_acc[...] = jnp.zeros_like(xt_acc)
        rm_acc[...] = jnp.zeros_like(rm_acc)
        mk_acc[...] = jnp.zeros_like(mk_acc)

    c, tm = xid_ref.shape
    cls = jax.lax.broadcasted_iota(jnp.int32, (c, tm), 0)            # [C, TM]

    # ---- loss_ID partials: CE(x, t) = logsumexp(x) - x[t] ----------------
    x = xid_ref[...].astype(jnp.float32)                              # [C, TM]
    tgt = tid_ref[...]                                                # [1, TM] int32 (pad = C)
    mx = jnp.max(x, axis=0, keepdims=True)                            # XLU
    se = jnp.sum(jnp.exp(x - mx), axis=0, keepdims=True)              # XLU
    # Padded columns (tgt == C) must not contribute their logsumexp.
    lse_acc[...] += jnp.where(tgt < c, mx + jnp.log(se), 0.0)         # [1, TM]
    xt_acc[...] += jnp.where(cls == tgt, x, 0.0)                      # [C, TM], VALU only

    # ---- loss_OOD partials: -log(1 - softmax + eps), NL-masked -----------
    y = xood_ref[...].astype(jnp.float32)                             # [C, TM]
    e = jnp.exp(y - jnp.max(y, axis=0, keepdims=True))                # XLU + EUP
    p = e * pl.reciprocal(jnp.sum(e, axis=0, keepdims=True))          # XLU + EUP (exact)
    res = -jnp.log(1.0 - p + eps)
    tl = tl_ref[...]                                                  # [K, TM] int32 (pad = -1)
    neg = cls == tl[0:1, :]
    for kk in range(1, tl_ref.shape[0]):                              # K static & small
        neg = jnp.logical_or(neg, cls == tl[kk:kk + 1, :])
    rm_acc[...] += jnp.where(neg, res, 0.0)                           # [C, TM], VALU only
    mk_acc[...] += jnp.where(neg, 1.0, 0.0)                           # [C, TM], VALU only

    # ---- finalize on this core's last tile: one big reduce + pack --------
    @pl.when(i == pl.num_programs(1) - 1)
    def _():
        def _total(a):                                                # [R, T] -> (1, 1)
            return jnp.sum(jnp.sum(a, axis=0, keepdims=True),
                           axis=1, keepdims=True)

        ce = _total(lse_acc[...]) - _total(xt_acc[...])
        rm = _total(rm_acc[...])
        mk = _total(mk_acc[...])
        lane = jax.lax.broadcasted_iota(jnp.int32, out_ref.shape, 2)
        out_ref[...] = jnp.where(lane == 0, ce,
                                 jnp.where(lane == 1, rm,
                                           jnp.where(lane == 2, mk, 0.0)))


def da_loss(outputs_ID, outputs_OOD, targets_ID, target_list_OOD,
            *, beta=BETA, eps=EPS):
    """Returns (loss_ID, loss_OOD, loss) scalars, matching DALoss (dy=='NL')."""
    n_id, c = outputs_ID.shape
    n_ood, c2 = outputs_OOD.shape
    assert c == c2
    k = len(target_list_OOD)
    assert k >= 1

    max_n = max(n_id, n_ood)
    tm = min(TM_MAX, _round_up(-(-max_n // NUM_CORES), 128))
    n_pad = _round_up(max_n, NUM_CORES * tm)
    tiles_per_core = n_pad // (NUM_CORES * tm)

    def pad_cols(a, value):
        pad = n_pad - a.shape[1]
        if pad == 0:
            return a
        return jnp.pad(a, ((0, 0), (0, pad)), constant_values=value)

    # Class-major (lane-dense batch) re-layout; native dtype preserved.
    xid = pad_cols(outputs_ID.T, 0)                                   # [C, N_pad]
    xood = pad_cols(outputs_OOD.T, 0)                                 # [C, N_pad]
    tid = pad_cols(targets_ID.astype(jnp.int32)[None, :], c)          # [1, N_pad]
    tl = pad_cols(jnp.stack(target_list_OOD).astype(jnp.int32), -1)   # [K, N_pad]

    def col(ci, i):
        return ci * tiles_per_core + i

    kernel = functools.partial(_daloss_kernel, eps=eps)
    out = pl.pallas_call(
        kernel,
        out_shape=jax.ShapeDtypeStruct((NUM_CORES, 1, 128), jnp.float32),
        grid_spec=pltpu.PrefetchScalarGridSpec(
            num_scalar_prefetch=0,
            grid=(NUM_CORES, tiles_per_core),
            in_specs=[
                pl.BlockSpec((c, tm), lambda ci, i: (0, col(ci, i))),
                pl.BlockSpec((1, tm), lambda ci, i: (0, col(ci, i))),
                pl.BlockSpec((c, tm), lambda ci, i: (0, col(ci, i))),
                pl.BlockSpec((k, tm), lambda ci, i: (0, col(ci, i))),
            ],
            out_specs=pl.BlockSpec((1, 1, 128), lambda ci, i: (ci, 0, 0)),
            scratch_shapes=[
                pltpu.VMEM((1, tm), jnp.float32),   # lse_acc
                pltpu.VMEM((c, tm), jnp.float32),   # xt_acc
                pltpu.VMEM((c, tm), jnp.float32),   # rm_acc
                pltpu.VMEM((c, tm), jnp.float32),   # mk_acc
            ],
        ),
        compiler_params=pltpu.CompilerParams(
            # Outer axis = per-core batch half (megacore on v7x); inner axis
            # carries the running reduction, so it must be "arbitrary".
            dimension_semantics=("parallel", "arbitrary"),
            vmem_limit_bytes=32 * 1024 * 1024,
        ),
    )(xid, tid, xood, tl)

    # Tiny cross-core combine + exact final divides (runs once, outside kernel).
    ce_tot = jnp.sum(out[:, 0, 0])
    rm_tot = jnp.sum(out[:, 0, 1])
    mk_tot = jnp.sum(out[:, 0, 2])
    loss_id = ce_tot / n_id
    loss_ood = rm_tot / mk_tot      # mk_tot == 0 -> inf/nan, same as PyTorch
    loss = loss_id + beta * loss_ood
    return loss_id, loss_ood, loss


def _da_loss_ref(outputs_ID, outputs_OOD, targets_ID, target_list_OOD):
    # Pure-JAX reference for a sanity check.
    logp = jax.nn.log_softmax(outputs_ID.astype(jnp.float32), axis=1)
    loss_id = -jnp.mean(logp[jnp.arange(outputs_ID.shape[0]), targets_ID])
    res = -jnp.log(1.0 - jax.nn.softmax(outputs_OOD.astype(jnp.float32), axis=1) + EPS)
    c = outputs_OOD.shape[1]
    mask = jnp.zeros_like(res)
    for tl in target_list_OOD:
        mask = jnp.maximum(mask, jax.nn.one_hot(tl, c, dtype=jnp.float32))
    loss_ood = jnp.sum(res * mask) / jnp.sum(mask)
    return loss_id, loss_ood, loss_id + BETA * loss_ood


if __name__ == "__main__":
    key = jax.random.PRNGKey(0)
    k1, k2, k3, k4, k5 = jax.random.split(key, 5)

    N_ID, N_OOD, K_NEG = 8, 8, 2
    outputs_ID = jax.random.normal(k1, (N_ID, NUM_CLASSES), dtype=jnp.float32)
    outputs_OOD = jax.random.normal(k2, (N_OOD, NUM_CLASSES), dtype=jnp.float32)
    targets_ID = jax.random.randint(k3, (N_ID,), 0, NUM_CLASSES, dtype=jnp.int32)
    target_list_OOD = [
        jax.random.randint(kk, (N_OOD,), 0, NUM_CLASSES, dtype=jnp.int32)
        for kk in (k4, k5)
    ][:K_NEG]

    # jit so the class-major transpose + pad fuse into the surrounding graph.
    da_loss_jit = jax.jit(da_loss)
    lid, lood, ltot = da_loss_jit(outputs_ID, outputs_OOD, targets_ID, target_list_OOD)
    jax.block_until_ready(ltot)

    rid, rood, rtot = _da_loss_ref(outputs_ID, outputs_OOD, targets_ID, target_list_OOD)
    assert jnp.allclose(lid, rid, rtol=1e-4, atol=1e-5), (lid, rid)
    assert jnp.allclose(lood, rood, rtol=1e-4, atol=1e-5), (lood, rood)
    assert jnp.allclose(ltot, rtot, rtol=1e-4, atol=1e-5), (ltot, rtot)

    print("KERNEL_OK")
</pallas_src>

<mosaic_0001>
module attributes {stable_mosaic.version = 11 : i64} {
  func.func @_daloss_kernel(%arg0: i32, %arg1: i32, %arg2: memref<10x128xf32, #tpu.memory_space<vmem>>, %arg3: memref<1x128xi32, #tpu.memory_space<vmem>>, %arg4: memref<10x128xf32, #tpu.memory_space<vmem>>, %arg5: memref<2x128xi32, #tpu.memory_space<vmem>>, %arg6: memref<1x1x128xf32, #tpu.memory_space<vmem>>, %arg7: memref<1x128xf32, #tpu.memory_space<vmem>>, %arg8: memref<10x128xf32, #tpu.memory_space<vmem>>, %arg9: memref<10x128xf32, #tpu.memory_space<vmem>>, %arg10: memref<10x128xf32, #tpu.memory_space<vmem>>) attributes {dimension_semantics = [#tpu.dimension_semantics<parallel>, #tpu.dimension_semantics<arbitrary>], iteration_bounds = array<i64: 2, 1>, scalar_prefetch = 0 : i64, scratch_operands = 4 : i64, tpu.core_type = #tpu.core_type<tc>, window_params = [{transform_indices = @transform_0, window_bounds = array<i64: 10, 128>}, {transform_indices = @transform_1, window_bounds = array<i64: 1, 128>}, {transform_indices = @transform_2, window_bounds = array<i64: 10, 128>}, {transform_indices = @transform_3, window_bounds = array<i64: 2, 128>}, {transform_indices = @transform_4, window_bounds = array<i64: 1, 1, 128>}]} {
    %c0_i32 = arith.constant 0 : i32
    %0 = arith.cmpi eq, %arg1, %c0_i32 : i32
    %1 = arith.extui %0 : i1 to i32
    %c0_i32_0 = arith.constant 0 : i32
    %2 = arith.cmpi ne, %1, %c0_i32_0 : i32
    scf.if %2 {
      %cst_37 = arith.constant 0.000000e+00 : f32
      %69 = vector.broadcast %cst_37 : f32 to vector<1x128xf32>
      %c0_38 = arith.constant 0 : index
      %c0_39 = arith.constant 0 : index
      %70 = vector.load %arg7[%c0_38, %c0_39] : memref<1x128xf32, #tpu.memory_space<vmem>>, vector<1x128xf32>
      tpu.vector_store %arg7[%c0_38, %c0_39], %69 {strides = array<i32>} : memref<1x128xf32, #tpu.memory_space<vmem>>, vector<1x128xf32>,
      %cst_40 = arith.constant 0.000000e+00 : f32
      %71 = vector.broadcast %cst_40 : f32 to vector<10x128xf32>
      %c0_41 = arith.constant 0 : index
      %c0_42 = arith.constant 0 : index
      %72 = vector.load %arg8[%c0_41, %c0_42] : memref<10x128xf32, #tpu.memory_space<vmem>>, vector<10x128xf32>
      tpu.vector_store %arg8[%c0_41, %c0_42], %71 {strides = array<i32>} : memref<10x128xf32, #tpu.memory_space<vmem>>, vector<10x128xf32>,
      %cst_43 = arith.constant 0.000000e+00 : f32
      %73 = vector.broadcast %cst_43 : f32 to vector<10x128xf32>
      %c0_44 = arith.constant 0 : index
      %c0_45 = arith.constant 0 : index
      %74 = vector.load %arg9[%c0_44, %c0_45] : memref<10x128xf32, #tpu.memory_space<vmem>>, vector<10x128xf32>
      tpu.vector_store %arg9[%c0_44, %c0_45], %73 {strides = array<i32>} : memref<10x128xf32, #tpu.memory_space<vmem>>, vector<10x128xf32>,
      %cst_46 = arith.constant 0.000000e+00 : f32
      %75 = vector.broadcast %cst_46 : f32 to vector<10x128xf32>
      %c0_47 = arith.constant 0 : index
      %c0_48 = arith.constant 0 : index
      %76 = vector.load %arg10[%c0_47, %c0_48] : memref<10x128xf32, #tpu.memory_space<vmem>>, vector<10x128xf32>
      tpu.vector_store %arg10[%c0_47, %c0_48], %75 {strides = array<i32>} : memref<10x128xf32, #tpu.memory_space<vmem>>, vector<10x128xf32>,
    } else {
    }
    %3 = tpu.iota {dimensions = array<i32: 0>} : vector<10x128xi32>
    %c0 = arith.constant 0 : index
    %c0_1 = arith.constant 0 : index
    %4 = vector.load %arg2[%c0, %c0_1] : memref<10x128xf32, #tpu.memory_space<vmem>>, vector<10x128xf32>
    %c0_2 = arith.constant 0 : index
    %c0_3 = arith.constant 0 : index
    %5 = vector.load %arg3[%c0_2, %c0_3] : memref<1x128xi32, #tpu.memory_space<vmem>>, vector<1x128xi32>
    %cst = arith.constant dense<0xFF800000> : vector<128xf32>
    %6 = vector.multi_reduction <maximumf>, %4, %cst [0] : vector<10x128xf32> to vector<128xf32>
    %7 = vector.shape_cast %6 : vector<128xf32> to vector<1x128xf32>
    %8 = vector.broadcast %7 : vector<1x128xf32> to vector<10x128xf32>
    %9 = arith.subf %4, %8 : vector<10x128xf32>
    %10 = math.exp %9 : vector<10x128xf32>
    %cst_4 = arith.constant dense<0.000000e+00> : vector<128xf32>
    %11 = vector.multi_reduction <add>, %10, %cst_4 [0] : vector<10x128xf32> to vector<128xf32>
    %12 = vector.shape_cast %11 : vector<128xf32> to vector<1x128xf32>
    %c0_5 = arith.constant 0 : index
    %c0_6 = arith.constant 0 : index
    %13 = vector.load %arg7[%c0_5, %c0_6] : memref<1x128xf32, #tpu.memory_space<vmem>>, vector<1x128xf32>
    %c10_i32 = arith.constant 10 : i32
    %14 = vector.broadcast %c10_i32 : i32 to vector<1x128xi32>
    %15 = arith.cmpi slt, %5, %14 : vector<1x128xi32>
    %16 = math.log %12 : vector<1x128xf32>
    %17 = arith.addf %7, %16 : vector<1x128xf32>
    %cst_7 = arith.constant 0.000000e+00 : f32
    %18 = vector.broadcast %cst_7 : f32 to vector<1x128xf32>
    %19 = arith.select %15, %17, %18 : vector<1x128xi1>, vector<1x128xf32>
    %20 = arith.addf %13, %19 : vector<1x128xf32>
    %c0_8 = arith.constant 0 : index
    %c0_9 = arith.constant 0 : index
    %21 = vector.load %arg7[%c0_8, %c0_9] : memref<1x128xf32, #tpu.memory_space<vmem>>, vector<1x128xf32>
    tpu.vector_store %arg7[%c0_8, %c0_9], %20 {strides = array<i32>} : memref<1x128xf32, #tpu.memory_space<vmem>>, vector<1x128xf32>,
    %c0_10 = arith.constant 0 : index
    %c0_11 = arith.constant 0 : index
    %22 = vector.load %arg8[%c0_10, %c0_11] : memref<10x128xf32, #tpu.memory_space<vmem>>, vector<10x128xf32>
    %23 = vector.broadcast %5 : vector<1x128xi32> to vector<10x128xi32>
    %24 = arith.cmpi eq, %3, %23 : vector<10x128xi32>
    %cst_12 = arith.constant 0.000000e+00 : f32
    %25 = vector.broadcast %cst_12 : f32 to vector<10x128xf32>
    %26 = arith.select %24, %4, %25 : vector<10x128xi1>, vector<10x128xf32>
    %27 = arith.addf %22, %26 : vector<10x128xf32>
    %c0_13 = arith.constant 0 : index
    %c0_14 = arith.constant 0 : index
    %28 = vector.load %arg8[%c0_13, %c0_14] : memref<10x128xf32, #tpu.memory_space<vmem>>, vector<10x128xf32>
    tpu.vector_store %arg8[%c0_13, %c0_14], %27 {strides = array<i32>} : memref<10x128xf32, #tpu.memory_space<vmem>>, vector<10x128xf32>,
    %c0_15 = arith.constant 0 : index
    %c0_16 = arith.constant 0 : index
    %29 = vector.load %arg4[%c0_15, %c0_16] : memref<10x128xf32, #tpu.memory_space<vmem>>, vector<10x128xf32>
    %cst_17 = arith.constant dense<0xFF800000> : vector<128xf32>
    %30 = vector.multi_reduction <maximumf>, %29, %cst_17 [0] : vector<10x128xf32> to vector<128xf32>
    %31 = vector.shape_cast %30 : vector<128xf32> to vector<1x128xf32>
    %32 = vector.broadcast %31 : vector<1x128xf32> to vector<10x128xf32>
    %33 = arith.subf %29, %32 : vector<10x128xf32>
    %34 = math.exp %33 : vector<10x128xf32>
    %cst_18 = arith.constant dense<0.000000e+00> : vector<128xf32>
    %35 = vector.multi_reduction <add>, %34, %cst_18 [0] : vector<10x128xf32> to vector<128xf32>
    %36 = vector.shape_cast %35 : vector<128xf32> to vector<1x128xf32>
    %37 = tpu.reciprocal %36 : vector<1x128xf32> -> vector<1x128xf32>
    %38 = vector.broadcast %37 : vector<1x128xf32> to vector<10x128xf32>
    %39 = arith.mulf %34, %38 : vector<10x128xf32>
    %cst_19 = arith.constant 1.000000e+00 : f32
    %40 = vector.broadcast %cst_19 : f32 to vector<10x128xf32>
    %41 = arith.subf %40, %39 : vector<10x128xf32>
    %cst_20 = arith.constant 9.99999974E-6 : f32
    %42 = vector.broadcast %cst_20 : f32 to vector<10x128xf32>
    %43 = arith.addf %41, %42 : vector<10x128xf32>
    %44 = math.log %43 : vector<10x128xf32>
    %cst_21 = arith.constant 0.000000e+00 : f32
    %45 = vector.broadcast %cst_21 : f32 to vector<10x128xf32>
    %46 = arith.subf %45, %44 : vector<10x128xf32>
    %c0_22 = arith.constant 0 : index
    %c0_23 = arith.constant 0 : index
    %47 = vector.load %arg5[%c0_22, %c0_23] : memref<2x128xi32, #tpu.memory_space<vmem>>, vector<2x128xi32>
    %48 = vector.extract_strided_slice %47 {offsets = [0, 0], sizes = [1, 128], strides = [1, 1]} : vector<2x128xi32> to vector<1x128xi32>
    %49 = vector.broadcast %48 : vector<1x128xi32> to vector<10x128xi32>
    %50 = arith.cmpi eq, %3, %49 : vector<10x128xi32>
    %51 = vector.extract_strided_slice %47 {offsets = [1, 0], sizes = [1, 128], strides = [1, 1]} : vector<2x128xi32> to vector<1x128xi32>
    %52 = vector.broadcast %51 : vector<1x128xi32> to vector<10x128xi32>
    %53 = arith.cmpi eq, %3, %52 : vector<10x128xi32>
    %54 = arith.ori %50, %53 : vector<10x128xi1>
    %c0_24 = arith.constant 0 : index
    %c0_25 = arith.constant 0 : index
    %55 = vector.load %arg9[%c0_24, %c0_25] : memref<10x128xf32, #tpu.memory_space<vmem>>, vector<10x128xf32>
    %cst_26 = arith.constant 0.000000e+00 : f32
    %56 = vector.broadcast %cst_26 : f32 to vector<10x128xf32>
    %57 = arith.select %54, %46, %56 : vector<10x128xi1>, vector<10x128xf32>
    %58 = arith.addf %55, %57 : vector<10x128xf32>
    %c0_27 = arith.constant 0 : index
    %c0_28 = arith.constant 0 : index
    %59 = vector.load %arg9[%c0_27, %c0_28] : memref<10x128xf32, #tpu.memory_space<vmem>>, vector<10x128xf32>
    tpu.vector_store %arg9[%c0_27, %c0_28], %58 {strides = array<i32>} : memref<10x128xf32, #tpu.memory_space<vmem>>, vector<10x128xf32>,
    %c0_29 = arith.constant 0 : index
    %c0_30 = arith.constant 0 : index
    %60 = vector.load %arg10[%c0_29, %c0_30] : memref<10x128xf32, #tpu.memory_space<vmem>>, vector<10x128xf32>
    %cst_31 = arith.constant 1.000000e+00 : f32
    %cst_32 = arith.constant 0.000000e+00 : f32
    %61 = vector.broadcast %cst_31 : f32 to vector<10x128xf32>
    %62 = vector.broadcast %cst_32 : f32 to vector<10x128xf32>
    %63 = arith.select %54, %61, %62 : vector<10x128xi1>, vector<10x128xf32>
    %64 = arith.addf %60, %63 : vector<10x128xf32>
    %c0_33 = arith.constant 0 : index
    %c0_34 = arith.constant 0 : index
    %65 = vector.load %arg10[%c0_33, %c0_34] : memref<10x128xf32, #tpu.memory_space<vmem>>, vector<10x128xf32>
    tpu.vector_store %arg10[%c0_33, %c0_34], %64 {strides = array<i32>} : memref<10x128xf32, #tpu.memory_space<vmem>>, vector<10x128xf32>,
    %c0_i32_35 = arith.constant 0 : i32
    %66 = arith.cmpi eq, %arg1, %c0_i32_35 : i32
    %67 = arith.extui %66 : i1 to i32
    %c0_i32_36 = arith.constant 0 : i32
    %68 = arith.cmpi ne, %67, %c0_i32_36 : i32
    scf.if %68 {
      %c0_37 = arith.constant 0 : index
      %c0_38 = arith.constant 0 : index
      %69 = vector.load %arg7[%c0_37, %c0_38] : memref<1x128xf32, #tpu.memory_space<vmem>>, vector<1x128xf32>
      %cst_39 = arith.constant dense<0.000000e+00> : vector<128xf32>
      %70 = vector.multi_reduction <add>, %69, %cst_39 [0] : vector<1x128xf32> to vector<128xf32>
      %71 = vector.shape_cast %70 : vector<128xf32> to vector<1x128xf32>
      %cst_40 = arith.constant dense<0.000000e+00> : vector<1xf32>
      %72 = vector.multi_reduction <add>, %71, %cst_40 [1] : vector<1x128xf32> to vector<1xf32>
      %73 = vector.shape_cast %72 : vector<1xf32> to vector<1x1xf32>
      %c0_41 = arith.constant 0 : index
      %c0_42 = arith.constant 0 : index
      %74 = vector.load %arg8[%c0_41, %c0_42] : memref<10x128xf32, #tpu.memory_space<vmem>>, vector<10x128xf32>
      %cst_43 = arith.constant dense<0.000000e+00> : vector<128xf32>
      %75 = vector.multi_reduction <add>, %74, %cst_43 [0] : vector<10x128xf32> to vector<128xf32>
      %76 = vector.shape_cast %75 : vector<128xf32> to vector<1x128xf32>
      %cst_44 = arith.constant dense<0.000000e+00> : vector<1xf32>
      %77 = vector.multi_reduction <add>, %76, %cst_44 [1] : vector<1x128xf32> to vector<1xf32>
      %78 = vector.shape_cast %77 : vector<1xf32> to vector<1x1xf32>
      %79 = arith.subf %73, %78 : vector<1x1xf32>
      %c0_45 = arith.constant 0 : index
      %c0_46 = arith.constant 0 : index
      %80 = vector.load %arg9[%c0_45, %c0_46] : memref<10x128xf32, #tpu.memory_space<vmem>>, vector<10x128xf32>
      %cst_47 = arith.constant dense<0.000000e+00> : vector<128xf32>
      %81 = vector.multi_reduction <add>, %80, %cst_47 [0] : vector<10x128xf32> to vector<128xf32>
      %82 = vector.shape_cast %81 : vector<128xf32> to vector<1x128xf32>
      %cst_48 = arith.constant dense<0.000000e+00> : vector<1xf32>
      %83 = vector.multi_reduction <add>, %82, %cst_48 [1] : vector<1x128xf32> to vector<1xf32>
      %84 = vector.shape_cast %83 : vector<1xf32> to vector<1x1xf32>
      %c0_49 = arith.constant 0 : index
      %c0_50 = arith.constant 0 : index
      %85 = vector.load %arg10[%c0_49, %c0_50] : memref<10x128xf32, #tpu.memory_space<vmem>>, vector<10x128xf32>
      %cst_51 = arith.constant dense<0.000000e+00> : vector<128xf32>
      %86 = vector.multi_reduction <add>, %85, %cst_51 [0] : vector<10x128xf32> to vector<128xf32>
      %87 = vector.shape_cast %86 : vector<128xf32> to vector<1x128xf32>
      %cst_52 = arith.constant dense<0.000000e+00> : vector<1xf32>
      %88 = vector.multi_reduction <add>, %87, %cst_52 [1] : vector<1x128xf32> to vector<1xf32>
      %89 = vector.shape_cast %88 : vector<1xf32> to vector<1x1xf32>
      %90 = tpu.iota {dimensions = array<i32: 2>} : vector<1x1x128xi32>
      %c0_i32_53 = arith.constant 0 : i32
      %91 = vector.broadcast %c0_i32_53 : i32 to vector<1x1x128xi32>
      %92 = arith.cmpi eq, %90, %91 : vector<1x1x128xi32>
      %c1_i32 = arith.constant 1 : i32
      %93 = vector.broadcast %c1_i32 : i32 to vector<1x1x128xi32>
      %94 = arith.cmpi eq, %90, %93 : vector<1x1x128xi32>
      %c2_i32 = arith.constant 2 : i32
      %95 = vector.broadcast %c2_i32 : i32 to vector<1x1x128xi32>
      %96 = arith.cmpi eq, %90, %95 : vector<1x1x128xi32>
      %cst_54 = arith.constant 0.000000e+00 : f32
      %97 = vector.shape_cast %89 : vector<1x1xf32> to vector<1x1x1xf32>
      %98 = vector.broadcast %97 : vector<1x1x1xf32> to vector<1x1x128xf32>
      %99 = vector.broadcast %cst_54 : f32 to vector<1x1x128xf32>
      %100 = arith.select %96, %98, %99 : vector<1x1x128xi1>, vector<1x1x128xf32>
      %101 = vector.shape_cast %84 : vector<1x1xf32> to vector<1x1x1xf32>
      %102 = vector.broadcast %101 : vector<1x1x1xf32> to vector<1x1x128xf32>
      %103 = arith.select %94, %102, %100 : vector<1x1x128xi1>, vector<1x1x128xf32>
      %104 = vector.shape_cast %79 : vector<1x1xf32> to vector<1x1x1xf32>
      %105 = vector.broadcast %104 : vector<1x1x1xf32> to vector<1x1x128xf32>
      %106 = arith.select %92, %105, %103 : vector<1x1x128xi1>, vector<1x1x128xf32>
      %c0_55 = arith.constant 0 : index
      %c0_56 = arith.constant 0 : index
      %c0_57 = arith.constant 0 : index
      %107 = vector.load %arg6[%c0_55, %c0_56, %c0_57] : memref<1x1x128xf32, #tpu.memory_space<vmem>>, vector<1x1x128xf32>
      tpu.vector_store %arg6[%c0_55, %c0_56, %c0_57], %106 {strides = array<i32>} : memref<1x1x128xf32, #tpu.memory_space<vmem>>, vector<1x1x128xf32>,
    } else {
    }
    return
  }
  func.func @transform_0(%arg0: i32, %arg1: i32) -> (i32, i32) {
    %c1_i32 = arith.constant 1 : i32
    %0 = arith.muli %arg0, %c1_i32 : i32
    %1 = arith.addi %0, %arg1 : i32
    %c0_i32 = arith.constant 0 : i32
    %c0_i32_0 = arith.constant 0 : i32
    return %c0_i32, %1 : i32, i32
  }
  func.func @transform_1(%arg0: i32, %arg1: i32) -> (i32, i32) {
    %c1_i32 = arith.constant 1 : i32
    %0 = arith.muli %arg0, %c1_i32 : i32
    %1 = arith.addi %0, %arg1 : i32
    %c0_i32 = arith.constant 0 : i32
    %c0_i32_0 = arith.constant 0 : i32
    return %c0_i32, %1 : i32, i32
  }
  func.func @transform_2(%arg0: i32, %arg1: i32) -> (i32, i32) {
    %c1_i32 = arith.constant 1 : i32
    %0 = arith.muli %arg0, %c1_i32 : i32
    %1 = arith.addi %0, %arg1 : i32
    %c0_i32 = arith.constant 0 : i32
    %c0_i32_0 = arith.constant 0 : i32
    return %c0_i32, %1 : i32, i32
  }
  func.func @transform_3(%arg0: i32, %arg1: i32) -> (i32, i32) {
    %c1_i32 = arith.constant 1 : i32
    %0 = arith.muli %arg0, %c1_i32 : i32
    %1 = arith.addi %0, %arg1 : i32
    %c0_i32 = arith.constant 0 : i32
    %c0_i32_0 = arith.constant 0 : i32
    return %c0_i32, %1 : i32, i32
  }
  func.func @transform_4(%arg0: i32, %arg1: i32) -> (i32, i32, i32) {
    %c0_i32 = arith.constant 0 : i32
    %c0_i32_0 = arith.constant 0 : i32
    %c0_i32_1 = arith.constant 0 : i32
    return %arg0, %c0_i32, %c0_i32_0 : i32, i32, i32
  }
}

</mosaic_0001>

<bundles_post_ra>
// kernel: da_loss.1
= control target key start
LH: loop header
LB: loop body
LE: loop exit
PB: predicated region body
PF: predicated region fallthrough
CT: control target
= control target key end

     0   :  { %s781_s15 = smov 0   ;;  %s783_s16 = smov 0   ;;  %s903_s0 = inlined_call_operand.vmem [shape: f32[10,256], index: 0, kind: input, shape index: {}]   ;;  %s904_s1 = inlined_call_operand.vmem [shape: s32[1,256], index: 1, kind: input, shape index: {}]   ;;  %s905_s2 = inlined_call_operand.vmem [shape: f32[10,256], index: 2, kind: input, shape index: {}]   ;;  %s906_s3 = inlined_call_operand.vmem [shape: s32[2,256], index: 3, kind: input, shape index: {}]   ;;  %s907_s4 = inlined_call_operand.vmem [shape: f32[2,1,128], index: 4, kind: output, shape index: {}]  }
   0x1   :  { %s785_s17 = smov 0   ;;  %s787_s18 = smov 0  }
   0x2   :  { %s789_s19 = smov 0  }
   0x3 LB: > { %s26_s20 = sadd.s32 1, %s749_s18  ;;  %p42_p1 = scmp.ne.s32.totalorder %s741_s16, %s737_s15  ;;  %s753_s19 = sphi %s789_s19, %s14_s19   ;;  %s749_s18 = sphi %s787_s18, %s916_s18   ;;  %s745_s17 = sphi %s785_s17, %s915_s17   ;;  %s741_s16 = sphi %s783_s16, %s914_s16   ;;  %s737_s15 = sphi %s781_s15, %s913_s15  }
   0x4   : > { %p28_p0 = scmp.ge.s32.totalorder %s26_s20, 2  ;;  %p43_p2 = scmp.eq.s32.totalorder %s753_s19, 0 }
   0x5   : > { %s35_s23 = sadd.s32 1, %s741_s16  ;;  %p647_p5 = scmp.ge.s32.totalorder %s753_s19, 2 }
   0x6   : > { %s918_s20 = smov (%p28_p0, %s26_s20), 0  ;;  %p812_p3 = por %p43_p2, %p42_p1 }
   0x7   : > { %s32_s22 = ssub.s32 %s749_s18, %s918_s20  ;;  %178 = sbr.rel (%p647_p5) target bundleno = 22 (0x16), region = 16 }
   0x8   : > { %p33_p4 = scmp.eq.s32.totalorder %s32_s22, 0 }
   0xa   : > { %s820_s24 = scalar_select %p33_p4, %s741_s16, %s35_s23  }
   0xc   : > { %181 = sbr.rel (!%p812_p3) target bundleno = 17 (0x11), region = 20  ;;  %s183_s25 = sand.u32 (%p812_p3), 1, %s741_s16  }
   0xd   : > { %s649_s26 = sshll.u32 (%p812_p3), %s749_s18, 3  ;;  %s648_s27 = sshll.u32 (%p812_p3), %s183_s25, 4 }
   0xe   : > { %s188_s30 = scalar_lea.vmem (%p812_p3), %s903_s0, %s649_s26  ;;  %s185_s5 = scalar_lea.vmem (%p812_p3), [#allocation6], %s648_s27 }
   0xf   : > { %v219_v0 = vld [vmem:[%s188_s30] sm:$0xff] (%p812_p3)  ;;  %v221_v1 = vld [vmem:[%s188_s30 + $0x10] sm:$0xff] (%p812_p3) }
  0x10   : > { %220 = vst [vmem:[%s185_s5] sm:$0xff] (%p812_p3), %v219_v0  ;;  %222 = vst [vmem:[%s185_s5 + $0x8] sm:$0xff] (%p812_p3), %v221_v1 }
  0x11 PF: > { %236 = sbr.rel (!%p812_p3) target bundleno = 22 (0x16), region = 62  ;;  %s238_s6 = sand.u32 (%p812_p3), 1, %s741_s16  }
  0x12   : > { %s651_s7 = sshll.u32 (%p812_p3), %s749_s18, 3  ;;  %s650_s8 = sshll.u32 (%p812_p3), %s238_s6, 4 }
  0x13   : > { %s243_s11 = scalar_lea.vmem (%p812_p3), %s905_s2, %s651_s7  ;;  %s240_s12 = scalar_lea.vmem (%p812_p3), [#allocation7], %s650_s8 }
  0x14   : > { %v274_v2 = vld [vmem:[%s243_s11] sm:$0xff] (%p812_p3)  ;;  %v276_v3 = vld [vmem:[%s243_s11 + $0x10] sm:$0xff] (%p812_p3) }
  0x15   : > { %275 = vst [vmem:[%s240_s12] sm:$0xff] (%p812_p3), %v274_v2  ;;  %277 = vst [vmem:[%s240_s12 + $0x8] sm:$0xff] (%p812_p3), %v276_v3 }
  0x16 PF: > { %p652_p6 = scmp.ge.s32.totalorder %s753_s19, 1  ;;  %p291_p7 = scmp.lt.s32.totalorder %s753_s19, 3 }
  0x18   : > { %p292_p8 = pnand %p652_p6, %p291_p7 }
  0x19   : > { %s298_s13 = sand.u32 (!%p292_p8), 1, %s737_s15   ;;  %p343_p9 = scmp.lt.s32.totalorder (!%p292_p8), %s745_s17, 1 }
  0x1a   : > { %295 = sbr.rel (%p292_p8) target bundleno = 290 (0x122), region = 104  ;;  %s653_s14 = sshll.u32 (!%p292_p8), %s298_s13, 4 }
  0x1b   : > { %s300_s21 = scalar_lea.vmem (!%p292_p8), [#allocation6], %s653_s14  ;;  %s307_s22 = scalar_lea.vmem (!%p292_p8), [#allocation7], %s653_s14 }
  0x1f   : > { %v368_v4 = vlaneseq  ;;  %v755_v5 = vmov 0.0   ;;  %vm374_vm0 = vcmask 1041408   ;;  %s920_s17 = smov (!%p343_p9, %s745_s17), 1  ;;  %v371_v7 = vld [vmem:[%s300_s21] sm:$0xff]  ;;  %v372_v8 = vld [vmem:[%s300_s21 + $0x8] sm:$0x3] }
  0x20   : > { %361 = vst [vmem:[#allocation2] sm:$0x1] %v755_v5  ;;  %363 = vst [vmem:[#allocation3 + $0x8] sm:$0x3] %v755_v5  ;;  %v419_v9 = vld [vmem:[%s307_s22] sm:$0xff]  ;;  %v375_v10 = vsel %vm374_vm0, %v372_v8, -inf  ;;  %s345_s25 = scalar_lea.vmem %s904_s1, %s920_s17  ;;  %s356_s6 = scalar_lea.vmem %s907_s4, %s920_s17 }
  0x21   : > { %365 = vst [vmem:[#allocation4] sm:$0x3] %v755_v5  ;;  %367 = vst [vmem:[#allocation5] sm:$0x3] %v755_v5  ;;  %v369_v6 = vshrl.u32 %v368_v4, 7  ;;  %s655_s26 = sshll.u32 %s920_s17, 1  ;;  %v376_v15 = vmax.f32 %v371_v7, %v375_v10 }
  0x22   : > { %v420_v12 = vld [vmem:[%s307_s22 + $0x8] sm:$0x3]  ;;  %s352_s29 = scalar_lea.vmem %s906_s3, %s655_s26  ;;  %v855_v17 = vld [vmem:[%s345_s25] sm:$0x1]  ;;  %vm492_vm10 = vcmask 1040384   ;;  %v534_v34 = vand.u32 127, %v368_v4 }
  0x23   : > { %v409_v11 = vsub.s32 0, %v369_v6  ;;  %v465_v13 = vsub.s32 1, %v369_v6  ;;  %v370_v14 = vadd.s32 8, %v369_v6  ;;  %v421_v16 = vsel %vm374_vm0, %v420_v12, -inf  ;;  %v456_v21 = vld [vmem:[%s352_s29] sm:$0x3] }
  0x24   : > { %v422_v18 = vmax.f32 %v419_v9, %v421_v16  ;;  %v377_v19 = vrot.slane %v376_v15, 4  ;;  %vm398_vm9 = vcmp.lt.s32.totalorder %v855_v17, 10  ;;  %vm537_vm11 = vcmp.eq.s32.totalorder %v534_v34, 2 }
  0x25   : > { %v410_v20 = vrot.slane %v855_v17, %v409_v11  ;;  %v460_v23 = vrot.slane %v456_v21, %v409_v11  ;;  %v466_v24 = vrot.slane %v456_v21, %v465_v13  ;;  %vm536_vm12 = vcmp.eq.s32.totalorder %v534_v34, 1 }
  0x26   : > { %v423_v22 = vrot.slane %v422_v18, 4  ;;  %v378_v26 = vmax.f32 %v376_v15, %v377_v19  ;;  %vm535_vm13 = vcmp.eq.s32.totalorder %v534_v34, 0 }
  0x27   : > { %v406_v25 = vld [vmem:[#allocation3 + $0x8] sm:$0x3]  ;;  %vm411_vm1 = vcmp.eq.s32.totalorder %v369_v6, %v410_v20  ;;  %vm412_vm2 = vcmp.eq.s32.totalorder %v370_v14, %v410_v20  ;;  %vm462_vm3 = vcmp.eq.s32.totalorder %v370_v14, %v460_v23  ;;  %vm461_vm4 = vcmp.eq.s32.totalorder %v369_v6, %v460_v23 }
  0x28   : > { %v858_v27 = vsel %vm411_vm1, %v371_v7, 0.0  ;;  %v414_v28 = vsel %vm412_vm2, %v372_v8, 0.0  ;;  %v424_v29 = vmax.f32 %v422_v18, %v423_v22  ;;  %v379_v30 = vrot.slane %v378_v26, 2  ;;  %v480_v35 = vld [vmem:[#allocation5] sm:$0x3] }
  0x29   : > { %v416_v31 = vadd.f32 %v414_v28, %v406_v25  ;;  %vm467_vm5 = vcmp.eq.s32.totalorder %v369_v6, %v466_v24  ;;  %vm468_vm6 = vcmp.eq.s32.totalorder %v370_v14, %v466_v24 }
  0x2a   : > { %v425_v32 = vrot.slane %v424_v29, 2  ;;  %v380_v33 = vmax.f32 %v378_v26, %v379_v30  ;;  %vm860_vm7 = vmor %vm461_vm4, %vm467_vm5 }
  0x2b   : > { %418 = vst [vmem:[#allocation3 + $0x8] sm:$0x3] %v416_v31  ;;  %vm864_vm8 = vmor %vm462_vm3, %vm468_vm6  ;;  %v481_v38 = vsel %vm860_vm7, 1.0, %v755_v5 }
  0x2c   : > { %v426_v36 = vmax.f32 %v424_v29, %v425_v32  ;;  %v381_v39 = vrot.slane %v380_v33, 1  ;;  %v482_v40 = vsel %vm864_vm8, 1.0, %v755_v5  ;;  %v397_v29 = vld [vmem:[#allocation2] sm:$0x1] }
  0x2d   : > { %v484_v42 = vadd.f32 %v482_v40, %v480_v35 }
  0x2e   : > { %v427_v41 = vrot.slane %v426_v36, 1  ;;  %v382_v43 = vmax.f32 %v380_v33, %v381_v39 }
  0x2f   : > { %486 = vst [vmem:[#allocation5] sm:$0x3] %v484_v42 }
  0x30   : > { %v428_v44 = vmax.f32 %v426_v36, %v427_v41  ;;  %v383_v45 = vsub.f32 %v371_v7, %v382_v43  ;;  %v384_v46 = vsub.f32 %v372_v8, %v382_v43 }
  0x32   : > { %v429_v47 = vsub.f32 %v419_v9, %v428_v44  ;;  %v430_v48 = vsub.f32 %v420_v12, %v428_v44  ;;  %v385_v49 = vmul.f32 1.442695, %v383_v45  ;;  %v387_v50 = vmul.f32 1.442695, %v384_v46  ;;  %v497_v19 = vld [vmem:[#allocation3 + $0x8] sm:$0x3] }
  0x33   : > { %v498_v21 = vsel %vm374_vm0, %v497_v19, 0.0 }
  0x34   : > { %v431_v51 = vmul.f32 1.442695, %v429_v47  ;;  %v433_v52 = vmul.f32 1.442695, %v430_v48  ;;  %699 = vpow2.f32 %v385_v49  ;;  %v499_v22 = vadd.f32 %v498_v21, %v858_v27 }
  0x35   : > { %701 = vpow2.f32 %v387_v50 }
  0x36   : > { %703 = vpow2.f32 %v431_v51  ;;  %v522_v53 = vld [vmem:[#allocation5] sm:$0x3]  ;;  %v500_v23 = vrot.slane %v499_v22, 4  ;;  %v472_v51 = vld [vmem:[#allocation4] sm:$0x3] }
  0x37   : > { %705 = vpow2.f32 %v433_v52  ;;  %v523_v54 = vsel %vm374_vm0, %v522_v53, 0.0 }
  0x38   : > { %v524_v55 = vadd.f32 %v523_v54, %v481_v38  ;;  %v501_v26 = vadd.f32 %v500_v23, %v499_v22 }
  0x3a   : > { %v525_v56 = vrot.slane %v524_v55, 4  ;;  %v502_v35 = vrot.slane %v501_v26, 2 }
  0x3c   : > { %v526_v57 = vadd.f32 %v525_v56, %v524_v55  ;;  %v503_v27 = vadd.f32 %v502_v35, %v501_v26 }
  0x3e   : > { %v527_v58 = vrot.slane %v526_v57, 2  ;;  %v504_v42 = vrot.slane %v503_v27, 1 }
  0x40   : > { %v528_v59 = vadd.f32 %v527_v58, %v526_v57  ;;  %v505_v17 = vadd.f32 %v504_v42, %v503_v27 }
  0x41   : > { %v700_v60 = vpop.eup %699 }
  0x42   : > { %v702_v61 = vpop.eup %701  ;;  %v529_v62 = vrot.slane %v528_v59, 1 }
  0x43   : > { %v704_v63 = vpop.eup %703  ;;  %v389_v0 = vsel %vm374_vm0, %v702_v61, 0.0 }
  0x44   : > { %v706_v1 = vpop.eup %705  ;;  %v390_v2 = vadd.f32 %v700_v60, %v389_v0  ;;  %v530_v3 = vadd.f32 %v529_v62, %v528_v59 }
  0x45   : > { %v435_v5 = vsel %vm374_vm0, %v706_v1, 0.0 }
  0x46   : > { %v391_v6 = vrot.slane %v390_v2, 4  ;;  %v436_v7 = vadd.f32 %v704_v63, %v435_v5  ;;  %531 = vadd.xlane.f32.xlu1 %v530_v3 }
  0x48   : > { %v392_v8 = vadd.f32 %v391_v6, %v390_v2  ;;  %v437_v9 = vrot.slane %v436_v7, 4 }
  0x4a   : > { %v393_v10 = vrot.slane %v392_v8, 2  ;;  %v438_v11 = vadd.f32 %v437_v9, %v436_v7 }
  0x4c   : > { %v394_v12 = vadd.f32 %v393_v10, %v392_v8  ;;  %v439_v13 = vrot.slane %v438_v11, 2 }
  0x4e   : > { %v395_v14 = vrot.slane %v394_v12, 1  ;;  %v440_v15 = vadd.f32 %v439_v13, %v438_v11 }
  0x50   : > { %v396_v16 = vadd.f32 %v395_v14, %v394_v12  ;;  %v441_v18 = vrot.slane %v440_v15, 1 }
  0x52   : > { %707 = vlog2.f32 %v396_v16  ;;  %v442_v20 = vadd.f32 %v441_v18, %v440_v15 }
  0x54   : > { %709 = vrcp.f32 %v442_v20 }
  0x5f   : > { %v708_v24 = vpop.eup %707 }
  0x60   : > { %v400_v25 = vmul.f32 0.6931472, %v708_v24 }
  0x61   : > { %v710_v28 = vpop.eup %709 }
  0x62   : > { %v401_v30 = vadd.f32 %v400_v25, %v382_v43  ;;  %v444_v31 = vmul.f32 %v710_v28, %v704_v63  ;;  %v445_v32 = vmul.f32 %v710_v28, %v706_v1 }
  0x64   : > { %v402_v33 = vsel %vm398_vm9, %v401_v30, 0.0  ;;  %v446_v36 = vsub.f32 1.0, %v444_v31  ;;  %v447_v38 = vsub.f32 1.0, %v445_v32 }
  0x65   : > { %v403_v39 = vadd.f32 %v402_v33, %v397_v29 }
  0x66   : > { %v448_v40 = vadd.f32 1e-05, %v446_v36  ;;  %v449_v41 = vadd.f32 1e-05, %v447_v38 }
  0x67   : > { %404 = vst [vmem:[#allocation2] sm:$0x1] %v403_v39 }
  0x68   : > { %711 = vlog2.f32 %v448_v40 }
  0x69   : > { %713 = vlog2.f32 %v449_v41 }
  0x6e   : > { %v490_v44 = vld [vmem:[#allocation2] sm:$0x1] }
  0x6f   : > { %v493_v45 = vsel %vm492_vm10, %v490_v44, 0.0 }
  0x70   : > { %494 = vadd.xlane.f32.xlu0 %v493_v45 }
  0x74   : > { %506 = vadd.xlane.f32.xlu0 %v505_v17 }
  0x75   : > { %v712_v43 = vpop.eup %711 }
  0x76   : > { %v714_v46 = vpop.eup %713  ;;  %v451_v47 = vmul.f32 0.6931472, %v712_v43 }
  0x77   : > { %v453_v48 = vmul.f32 0.6931472, %v714_v46 }
  0x78   : > { %v454_v49 = vsub.f32 0.0, %v451_v47 }
  0x79   : > { %v455_v50 = vsub.f32 0.0, %v453_v48 }
  0x7a   : > { %v473_v52 = vsel %vm860_vm7, %v454_v49, 0.0 }
  0x7b   : > { %v474_v53 = vsel %vm864_vm8, %v455_v50, 0.0 }
  0x7c   : > { %v476_v54 = vadd.f32 %v474_v53, %v472_v51 }
  0x7e   : > { %478 = vst [vmem:[#allocation4] sm:$0x3] %v476_v54 }
  0x85   : > { %v510_v55 = vld [vmem:[#allocation4] sm:$0x3] }
  0x86   : > { %v511_v56 = vsel %vm374_vm0, %v510_v55, 0.0 }
  0x87   : > { %v512_v57 = vadd.f32 %v511_v56, %v473_v52 }
  0x89   : > { %v513_v58 = vrot.slane %v512_v57, 4 }
  0x8b   : > { %v514_v59 = vadd.f32 %v513_v58, %v512_v57 }
  0x8d   : > { %v515_v60 = vrot.slane %v514_v59, 2 }
  0x8f   : > { %v516_v61 = vadd.f32 %v515_v60, %v514_v59 }
  0x91   : > { %v517_v62 = vrot.slane %v516_v61, 1 }
  0x93   : > { %v518_v63 = vadd.f32 %v517_v62, %v516_v61 }
  0x95   : > { %519 = vadd.xlane.f32.xlu1 %v518_v63 }
  0xcf   : > { %v532_v1 = vpop.xlane.xlu1 %531 }
  0xd0   : > { %v538_v3 = vsel %vm537_vm11, %v532_v1, 0.0 }
  0xf9   : > { %v495_v0 = vpop.xlane.xlu0 %494 }
  0xfd   : > { %v507_v37 = vpop.xlane.xlu0 %506 }
  0xfe   : > { %v508_v2 = vsub.f32 %v495_v0, %v507_v37 }
 0x11e   : > { %v520_v5 = vpop.xlane.xlu1 %519 }
 0x11f   : > { %v539_v6 = vsel %vm536_vm12, %v520_v5, %v538_v3 }
 0x120   : > { %v540_v7 = vsel %vm535_vm13, %v508_v2, %v539_v6 }
 0x121   : > { %541 = vst [vmem:[%s356_s6] sm:$0x1] %v540_v7 }
 0x122 PF: > { %s14_s19 = sadd.s32 1, %s753_s19   ;;  %s913_s15 = smov %s741_s16 }
 0x123   : > { %p11_p10 = scmp.ge.s32.totalorder %s14_s19, 4   ;;  %s914_s16 = smov %s820_s24 }
 0x124   : > { %s915_s17 = smov %s749_s18  ;;  %s916_s18 = smov %s918_s20 }
 0x125   :  { %13 = sbr.rel (!%p11_p10) target bundleno = 3 (0x3), region = 169 }

</bundles_post_ra>
